<compile_context>
chip_gen: v6e
topology: v6e:2x2x1
jax: 0.10.0
libtpu: 0.0.40
codegen_flags: <defaults>
</compile_context>

<pallas_src>
import functools

import jax
import jax.numpy as jnp
from jax.experimental import pallas as pl
from jax.experimental.pallas import tpu as pltpu


# ----------------------------------------------------------------------------
# Helpers
# ----------------------------------------------------------------------------
def _round_up(x, m):
    return ((x + m - 1) // m) * m


def _pad2(a, shape):
    return jnp.pad(a, [(0, t - s) for s, t in zip(a.shape, shape)])


# ----------------------------------------------------------------------------
# Kernel 1: per-node-type linear projection + ReLU (row-tiled, lane-padded)
#   y = relu(x @ W_t + b)
# ----------------------------------------------------------------------------
def _linear_relu_kernel(x_ref, w_ref, b_ref, o_ref):
    y = jnp.dot(x_ref[...].astype(jnp.bfloat16), w_ref[...],
                preferred_element_type=jnp.float32)
    y = y + b_ref[...]                       # (1, Dp) broadcasts
    o_ref[...] = jnp.maximum(y, 0.0).astype(o_ref.dtype)


def linear_relu(x, w, b, *, dp_out, row_tile):
    """x: [N, Din]; w: [Dout, Din] (torch layout); b: [Dout].

    Returns [N, dp_out] f32 with columns >= Dout zero (lane padding kept)."""
    n, din = x.shape
    dout = w.shape[0]
    dp_in = _round_up(din, 128)
    tm = min(row_tile, _round_up(n, 8))
    n_pad = _round_up(n, tm)

    xp = _pad2(x, (n_pad, dp_in))
    wt = _pad2(jnp.transpose(w), (dp_in, dp_out)).astype(jnp.bfloat16)
    bp = _pad2(b.reshape(1, dout), (1, dp_out))

    out = pl.pallas_call(
        _linear_relu_kernel,
        out_shape=jax.ShapeDtypeStruct((n_pad, dp_out), jnp.float32),
        grid=(n_pad // tm,),
        in_specs=[
            pl.BlockSpec((tm, dp_in), lambda i: (i, 0)),
            pl.BlockSpec((dp_in, dp_out), lambda i: (0, 0)),
            pl.BlockSpec((1, dp_out), lambda i: (0, 0)),
        ],
        out_specs=pl.BlockSpec((tm, dp_out), lambda i: (i, 0)),
        compiler_params=pltpu.CompilerParams(
            dimension_semantics=("parallel",)),
    )(xp, wt, bp)
    return out[:n]


# ----------------------------------------------------------------------------
# Kernel 2: basis projection  y_j = x @ W_j  for W_all = [root, basis_0..B-1]
#   (moves the per-relation weight matmul out of the N^2 aggregation loop)
# ----------------------------------------------------------------------------
def _basis_project_kernel(x_ref, w_ref, o_ref):
    o_ref[0] = jnp.dot(x_ref[...].astype(jnp.bfloat16), w_ref[0],
                       preferred_element_type=jnp.float32)


def basis_project(x, w_all, tm):
    """x: [Np, Dp_in] f32; w_all: [B+1, Dp_in, Dp_out] bf16 -> [B+1, Np, Dp_out] f32."""
    n_pad, dp_in = x.shape
    nb, _, dp_out = w_all.shape
    return pl.pallas_call(
        _basis_project_kernel,
        out_shape=jax.ShapeDtypeStruct((nb, n_pad, dp_out), jnp.float32),
        grid=(n_pad // tm, nb),
        in_specs=[
            pl.BlockSpec((tm, dp_in), lambda i, j: (i, 0)),
            pl.BlockSpec((1, dp_in, dp_out), lambda i, j: (j, 0, 0)),
        ],
        out_specs=pl.BlockSpec((1, tm, dp_out), lambda i, j: (j, i, 0)),
        compiler_params=pltpu.CompilerParams(
            dimension_semantics=("parallel", "parallel")),
    )(x, w_all)


# ----------------------------------------------------------------------------
# Kernel 3: relational aggregation + optional ReLU + PairNorm pass 1
#   acc(tile) = z_root(tile) + sum_r A_r(tile, :) @ z_r
#   h = relu(acc) [optional]; emit h and per-tile (col-sum, sum-of-squares)
# Grid: (row_tiles [parallel], relations [arbitrary, innermost]).
# ----------------------------------------------------------------------------
def _rgcn_agg_kernel(adj_ref, z_ref, zr_ref, h_ref, stats_ref, acc_ref,
                     *, apply_relu):
    r = pl.program_id(1)

    @pl.when(r == 0)
    def _():
        acc_ref[...] = zr_ref[...]

    # bf16 x bf16 -> f32 accumulate on the MXU
    acc_ref[...] += jnp.dot(adj_ref[0], z_ref[0],
                            preferred_element_type=jnp.float32)

    @pl.when(r == pl.num_programs(1) - 1)
    def _():
        h = acc_ref[...]
        if apply_relu:
            h = jnp.maximum(h, 0.0)
        h_ref[...] = h
        # PairNorm pass 1: per-row-tile partial statistics (f32).
        dp = h.shape[1]
        colsum = jnp.sum(h, axis=0, keepdims=True)          # (1, dp)
        sqsum = jnp.sum(h * h, axis=0, keepdims=True)        # (1, dp)
        row_idx = jax.lax.broadcasted_iota(jnp.int32, (8, dp), 0)
        stats_ref[0] = jnp.where(row_idx == 0, colsum,
                                 jnp.where(row_idx == 1, sqsum, 0.0))


def rgcn_aggregate(adj, z_rel, z_root, tm, apply_relu,
                   vmem_limit=48 * 1024 * 1024):
    n_rel, n_pad, _ = adj.shape
    dp_out = z_rel.shape[-1]
    n_tiles = n_pad // tm

    flops = 2 * n_rel * n_pad * n_pad * dp_out
    bytes_accessed = (adj.size * 2 + n_tiles * z_rel.size * 2
                      + z_root.size * 4 + n_pad * dp_out * 4)

    kernel = functools.partial(_rgcn_agg_kernel, apply_relu=apply_relu)
    return pl.pallas_call(
        kernel,
        out_shape=(jax.ShapeDtypeStruct((n_pad, dp_out), jnp.float32),
                   jax.ShapeDtypeStruct((n_tiles, 8, dp_out), jnp.float32)),
        grid_spec=pltpu.PrefetchScalarGridSpec(
            num_scalar_prefetch=0,
            grid=(n_tiles, n_rel),
            in_specs=[
                pl.BlockSpec((1, tm, n_pad), lambda i, r: (r, i, 0)),
                pl.BlockSpec((1, n_pad, dp_out), lambda i, r: (r, 0, 0)),
                pl.BlockSpec((tm, dp_out), lambda i, r: (i, 0)),
            ],
            out_specs=[
                pl.BlockSpec((tm, dp_out), lambda i, r: (i, 0)),
                pl.BlockSpec((1, 8, dp_out), lambda i, r: (i, 0, 0)),
            ],
            scratch_shapes=[pltpu.VMEM((tm, dp_out), jnp.float32)],
        ),
        compiler_params=pltpu.CompilerParams(
            dimension_semantics=("parallel", "arbitrary"),
            vmem_limit_bytes=vmem_limit),
        cost_estimate=pl.CostEstimate(
            flops=int(flops), transcendentals=0,
            bytes_accessed=int(bytes_accessed)),
    )(adj, z_rel, z_root)


# ----------------------------------------------------------------------------
# Kernel 4: PairNorm pass 2 — apply centering + rsqrt scale, mask padded rows
# ----------------------------------------------------------------------------
def _pairnorm_apply_kernel(h_ref, p_ref, o_ref, *, row_tile, n_valid):
    i = pl.program_id(0)
    h = h_ref[...]
    mu = p_ref[0:1, :]
    inv = p_ref[1:2, :]
    out = (h - mu) * inv
    rows = i * row_tile + jax.lax.broadcasted_iota(jnp.int32, h.shape, 0)
    o_ref[...] = jnp.where(rows < n_valid, out, 0.0).astype(o_ref.dtype)


def pairnorm_apply(h, pn_params, tm, n_valid):
    n_pad, dp = h.shape
    kernel = functools.partial(_pairnorm_apply_kernel,
                               row_tile=tm, n_valid=n_valid)
    return pl.pallas_call(
        kernel,
        out_shape=jax.ShapeDtypeStruct((n_pad, dp), jnp.float32),
        grid=(n_pad // tm,),
        in_specs=[
            pl.BlockSpec((tm, dp), lambda i: (i, 0)),
            pl.BlockSpec((2, dp), lambda i: (0, 0)),
        ],
        out_specs=pl.BlockSpec((tm, dp), lambda i: (i, 0)),
        compiler_params=pltpu.CompilerParams(
            dimension_semantics=("parallel",)),
    )(h, pn_params)


# ----------------------------------------------------------------------------
# One RGCN layer + ReLU + PairNorm (two-pass, cross-tile statistics)
# ----------------------------------------------------------------------------
def rgcn_pairnorm_layer(x, adj, conv, *, n_valid, tm, apply_relu, eps=1e-5):
    """x: [Np, Dp_in] f32 (row/col padded); adj: [R, Np, Np] bf16."""
    n_pad, dp_in = x.shape
    din, dout = conv['root'].shape
    dp_out = _round_up(dout, 128)

    # stack [root, basis_0..B-1], zero-padded to lane-dense shapes, bf16.
    root_p = jnp.pad(conv['root'], ((0, dp_in - din), (0, dp_out - dout)))
    basis_p = jnp.pad(conv['basis'],
                      ((0, 0), (0, dp_in - din), (0, dp_out - dout)))
    w_all = jnp.concatenate([root_p[None], basis_p], axis=0).astype(jnp.bfloat16)

    # 1. basis projection (Pallas): y[0] = x@root, y[1+b] = x@basis_b
    y = basis_project(x, w_all, tm)                       # [B+1, Np, Dp_out] f32
    z_root = y[0]
    # tiny glue contraction over bases (B << R)
    z_rel = jnp.einsum('rb,bnd->rnd', conv['comp'], y[1:]).astype(jnp.bfloat16)

    # 2. aggregation + ReLU + PairNorm pass 1 (Pallas)
    h, stats = rgcn_aggregate(adj, z_rel, z_root, tm, apply_relu)

    # 3. reduce per-tile stats (glue, tiny); padded rows/cols contribute zero.
    colsum = jnp.sum(stats[:, 0, :], axis=0)              # [Dp_out]
    sqtot = jnp.sum(stats[:, 1, :])                       # scalar
    mu = colsum / float(n_valid)
    msq = sqtot / float(n_valid) - jnp.sum(mu * mu)       # mean ||h - mu||^2
    inv = jax.lax.rsqrt(eps + msq)
    pn_params = jnp.concatenate(
        [mu.reshape(1, dp_out), jnp.broadcast_to(inv, (1, dp_out))], axis=0)

    # 4. PairNorm pass 2 (Pallas): (h - mu) * inv, padded rows forced to zero.
    return pairnorm_apply(h, pn_params, tm, n_valid)


# ----------------------------------------------------------------------------
# Glue: dense relational adjacency (mean aggregation), bf16 for the MXU
# ----------------------------------------------------------------------------
def build_relational_adjacency(edge_index, edge_type, num_nodes_padded,
                               num_relations):
    src, dst = edge_index[0], edge_index[1]
    adj = jnp.zeros((num_relations, num_nodes_padded, num_nodes_padded),
                    jnp.float32)
    adj = adj.at[edge_type, dst, src].add(1.0)
    deg = jnp.sum(adj, axis=-1, keepdims=True)            # in-degree per relation
    adj = adj / jnp.maximum(deg, 1.0)                     # mean aggr; 0 rows stay 0
    return adj.astype(jnp.bfloat16)


# ----------------------------------------------------------------------------
# Full forward pass
# ----------------------------------------------------------------------------
def pairnorm_rgcn_forward(x_dict, node_types, edge_index, edge_type, params,
                          num_relations, row_tile=256):
    hidden_dim = params['convs'][0]['root'].shape[0]
    hidden_pad = _round_up(hidden_dim, 128)

    # 1. per-node-type projection + ReLU (lane-padded to hidden_pad), concat
    projected = [
        linear_relu(x_dict[nt], params['proj'][nt]['w'],
                    params['proj'][nt]['b'], dp_out=hidden_pad,
                    row_tile=row_tile)
        for nt in node_types
    ]
    x = jnp.concatenate(projected, axis=0)                # [Nr, hidden_pad]
    n_valid = x.shape[0]

    # 2. pad rows once to a multiple of the row tile; padded rows stay zero.
    tm = min(row_tile, _round_up(n_valid, 8))
    n_pad = _round_up(n_valid, tm)
    x = jnp.pad(x, ((0, n_pad - n_valid), (0, 0)))

    adj = build_relational_adjacency(edge_index, edge_type, n_pad,
                                     num_relations)

    x_latents = []
    num_layers = len(params['convs'])
    for li, conv in enumerate(params['convs']):
        is_last = li == num_layers - 1
        dout = conv['root'].shape[1]
        x = rgcn_pairnorm_layer(x, adj, conv, n_valid=n_valid, tm=tm,
                                apply_relu=not is_last)
        if not is_last:
            x_latents.append(x[:n_valid, :dout])
    out_dim = params['convs'][-1]['root'].shape[1]
    return x[:n_valid, :out_dim], x_latents


# ----------------------------------------------------------------------------
# Deterministic parameter construction
# ----------------------------------------------------------------------------
def make_params(key, node_in_dims, hidden_dim, out_dim, num_relations,
                num_bases, num_layers):
    params = {'proj': {}, 'convs': []}
    for nt, din in node_in_dims.items():
        key, k1, k2 = jax.random.split(key, 3)
        params['proj'][nt] = {
            'w': jax.random.normal(k1, (hidden_dim, din), jnp.float32) * 0.1,
            'b': jax.random.normal(k2, (hidden_dim,), jnp.float32) * 0.1,
        }
    dims = [hidden_dim] * (num_layers - 1) + [out_dim]
    din = hidden_dim
    for dout in dims:
        key, k1, k2, k3 = jax.random.split(key, 4)
        params['convs'].append({
            'basis': jax.random.normal(k1, (num_bases, din, dout),
                                       jnp.float32) * 0.1,
            'comp': jax.random.normal(k2, (num_relations, num_bases),
                                      jnp.float32) * 0.1,
            'root': jax.random.normal(k3, (din, dout), jnp.float32) * 0.1,
        })
        din = dout
    return params


if __name__ == "__main__":
    key = jax.random.PRNGKey(0)

    # metadata: 2 node types, 3 edge types (relations)
    node_types = ['author', 'paper']
    node_counts = {'author': 24, 'paper': 40}
    node_in_dims = {'author': 12, 'paper': 20}
    num_relations = 3
    hidden_dim, out_dim, num_bases, num_layers = 32, 16, 2, 2

    # node features
    x_dict = {}
    for nt in node_types:
        key, k = jax.random.split(key)
        x_dict[nt] = jax.random.normal(
            k, (node_counts[nt], node_in_dims[nt]), jnp.float32)

    # homogeneous edge_index / edge_type (as produced by data.to_homogeneous())
    num_nodes = sum(node_counts.values())
    num_edges = 128
    key, k1, k2, k3 = jax.random.split(key, 4)
    edge_index = jnp.stack([
        jax.random.randint(k1, (num_edges,), 0, num_nodes),
        jax.random.randint(k2, (num_edges,), 0, num_nodes),
    ])
    edge_type = jax.random.randint(k3, (num_edges,), 0, num_relations)

    key, k = jax.random.split(key)
    params = make_params(k, node_in_dims, hidden_dim, out_dim,
                         num_relations, num_bases, num_layers)

    # row_tile=16 so the toy graph exercises multiple row tiles (cross-tile
    # PairNorm reduction, parallel row axis); use 256+ for realistic N
    # (re-derive per generation: ~256 rows keeps the bf16 adjacency tile
    # comfortably inside v7x's 64 MiB VMEM).
    out, latents = pairnorm_rgcn_forward(
        x_dict, node_types, edge_index, edge_type, params, num_relations,
        row_tile=16)

    jax.block_until_ready(out)
    jax.block_until_ready(latents)
    assert out.shape == (num_nodes, out_dim)
    assert len(latents) == num_layers - 1
    assert latents[0].shape == (num_nodes, hidden_dim)
    assert bool(jnp.all(jnp.isfinite(out)))
    print("KERNEL_OK")
</pallas_src>

<mosaic_0001>
module attributes {stable_mosaic.version = 11 : i64} {
  func.func @_linear_relu_kernel(%arg0: i32, %arg1: memref<16x128xf32, #tpu.memory_space<vmem>>, %arg2: memref<128x128xbf16, #tpu.memory_space<vmem>>, %arg3: memref<1x128xf32, #tpu.memory_space<vmem>>, %arg4: memref<16x128xf32, #tpu.memory_space<vmem>>) attributes {dimension_semantics = [#tpu.dimension_semantics<parallel>], iteration_bounds = array<i64: 2>, scalar_prefetch = 0 : i64, scratch_operands = 0 : i64, tpu.core_type = #tpu.core_type<tc>, window_params = [{transform_indices = @transform_0, window_bounds = array<i64: 16, 128>}, {pipeline_mode = #tpu.pipeline_mode<synchronous>, transform_indices = @transform_1, window_bounds = array<i64: 128, 128>}, {pipeline_mode = #tpu.pipeline_mode<synchronous>, transform_indices = @transform_2, window_bounds = array<i64: 1, 128>}, {transform_indices = @transform_3, window_bounds = array<i64: 16, 128>}]} {
    %c0 = arith.constant 0 : index
    %c0_0 = arith.constant 0 : index
    %0 = vector.load %arg1[%c0, %c0_0] : memref<16x128xf32, #tpu.memory_space<vmem>>, vector<16x128xf32>
    %1 = arith.truncf %0 : vector<16x128xf32> to vector<16x128xbf16>
    %c0_1 = arith.constant 0 : index
    %c0_2 = arith.constant 0 : index
    %2 = vector.load %arg2[%c0_1, %c0_2] : memref<128x128xbf16, #tpu.memory_space<vmem>>, vector<128x128xbf16>
    %cst = arith.constant dense<0.000000e+00> : vector<16x128xf32>
    %3 = tpu.matmul %1, %2, %cst {dimension_numbers = #tpu.dot_dimension_numbers<[1], [0], [0], [1], [0, 0, 1, 1], [], []>} : vector<16x128xbf16>, vector<128x128xbf16>, vector<16x128xf32> -> vector<16x128xf32>
    %c0_3 = arith.constant 0 : index
    %c0_4 = arith.constant 0 : index
    %4 = vector.load %arg3[%c0_3, %c0_4] : memref<1x128xf32, #tpu.memory_space<vmem>>, vector<1x128xf32>
    %5 = vector.broadcast %4 : vector<1x128xf32> to vector<16x128xf32>
    %6 = arith.addf %3, %5 : vector<16x128xf32>
    %cst_5 = arith.constant 0.000000e+00 : f32
    %7 = vector.broadcast %cst_5 : f32 to vector<16x128xf32>
    %8 = arith.maximumf %6, %7 : vector<16x128xf32>
    %c0_6 = arith.constant 0 : index
    %c0_7 = arith.constant 0 : index
    %9 = vector.load %arg4[%c0_6, %c0_7] : memref<16x128xf32, #tpu.memory_space<vmem>>, vector<16x128xf32>
    tpu.vector_store %arg4[%c0_6, %c0_7], %8 {strides = array<i32>} : memref<16x128xf32, #tpu.memory_space<vmem>>, vector<16x128xf32>,
    return
  }
  func.func @transform_0(%arg0: i32) -> (i32, i32) {
    %c0_i32 = arith.constant 0 : i32
    %c0_i32_0 = arith.constant 0 : i32
    return %arg0, %c0_i32 : i32, i32
  }
  func.func @transform_1(%arg0: i32) -> (i32, i32) {
    %c0_i32 = arith.constant 0 : i32
    %c0_i32_0 = arith.constant 0 : i32
    %c0_i32_1 = arith.constant 0 : i32
    return %c0_i32, %c0_i32_0 : i32, i32
  }
  func.func @transform_2(%arg0: i32) -> (i32, i32) {
    %c0_i32 = arith.constant 0 : i32
    %c0_i32_0 = arith.constant 0 : i32
    %c0_i32_1 = arith.constant 0 : i32
    return %c0_i32, %c0_i32_0 : i32, i32
  }
  func.func @transform_3(%arg0: i32) -> (i32, i32) {
    %c0_i32 = arith.constant 0 : i32
    %c0_i32_0 = arith.constant 0 : i32
    return %arg0, %c0_i32 : i32, i32
  }
}

</mosaic_0001>

<bundles_post_ra>
// kernel: tpu_custom_call.1
= control target key start
LH: loop header
LB: loop body
LE: loop exit
PB: predicated region body
PF: predicated region fallthrough
CT: control target
= control target key end

     0   :  { %8 = vsyncpa [#allocation3], 0  ;;  %s895_s0 = inlined_call_operand.hbm [shape: f32[32,128], index: 0, kind: input, shape index: {}]   ;;  %s896_s1 = inlined_call_operand.hbm [shape: bf16[128,128], index: 1, kind: input, shape index: {}]   ;;  %s897_s2 = inlined_call_operand.vmem [shape: f32[1,128], index: 2, kind: input, shape index: {}]   ;;  %s898_s3 = inlined_call_operand.hbm [shape: f32[32,128], index: 3, kind: output, shape index: {}]  }
   0x1   :  { %10 = vsyncpa [#allocation3 + $0x1], 0 }
   0x2   :  { %11 = vsyncpa [#allocation6], 0 }
   0x3   :  { %12 = vsyncpa [#allocation4], 0 }
   0x4   :  { %14 = vsyncpa [#allocation4 + $0x1], 0  ;;  %s707_s12 = smov 0   ;;  %s709_s13 = smov 0  }
   0x5   :  { %s711_s14 = smov 0   ;;  %s713_s15 = smov 0  }
   0x6 LB: > { %s728_s16 = sadd.s32 4294967295, %s674_s15   ;;  %s423_s17 = sadd.s32 4294967294, %s674_s15   ;;  %s674_s15 = sphi %s713_s15, %s920_s15   ;;  %s670_s14 = sphi %s711_s14, %s919_s14   ;;  %s666_s13 = sphi %s709_s13, %s918_s13   ;;  %s662_s12 = sphi %s707_s12, %s917_s12  }
   0x7   : > { %p40_p0 = scmp.ne.s32.totalorder %s666_s13, %s662_s12  ;;  %p899_p1 = scmp.eq.s32.totalorder %s728_s16, 0 }
   0x8   : > { %p112_p3 = scmp.eq.s32.totalorder %s423_s17, 1  ;;  %p424_p5 = scmp.ge.s32.totalorder %s674_s15, 1 }
   0x9   : > { %p737_p4 = por %p899_p1, %p40_p0  ;;  %p119_p7 = scmp.lt.s32.totalorder %s674_s15, 3 }
   0xa   : > { %p742_p6 = por %p112_p3, %p40_p0  ;;  %s676_s21 = smov [#allocation5]  }
   0xb   : > { %s903_s18 = scalar_select %p737_p4, 1, 0 }
   0xc   : > { %s904_s19 = scalar_select %p742_p6, 1, 0 }
   0xd   : > { %p747_p8 = pnand %p424_p5, %p119_p7  ;;  %s131_s22 = sshll.u32 %s676_s21, 4  ;;  %s132_s22 = int_to_ptr.vmem [resolvable:$true] %s131_s22 }
   0xe   : > { %s761_s24 = sadd.s32 1, %s674_s15   ;;  %s27_s25 = sadd.s32 1, %s670_s14 }
   0xf   : > { %s905_s20 = scalar_select %p747_p8, 1, 0 }
  0x10   : > { %p487_p9 = pneg %p747_p8  ;;  %s24_s26 = ssub.s32 %s674_s15, %s761_s24 }
  0x11   : > { %s563_s27 = scalar_lea.vmem %s132_s22, 1024  ;;  %p571_p5 = scmp.lt.s32.totalorder %s132_s22, %s132_s22 }
  0x12   : > { %p756_p11 = pnand %p487_p9, %p899_p1  ;;  %p564_p13 = scmp.ne.s32.totalorder %s132_s22, %s563_s27 }
  0x13   : > { %p572_p7 = scmp.lt.s32.totalorder %s563_s27, %s563_s27 }
  0x14   : > { %p554_p12 = pneg %p756_p11 }
  0x15   : > { %p573_p10 = por %p572_p7, %p571_p5 }
  0x16   : > { %p566_p0 = pnand %p564_p13, %p554_p12 }
  0x18   : > { %p567_p3 = pneg %p566_p0 }
  0x1a   : > { %p574_p2 = pnand %p573_p10, %p567_p3 }
  0x1c   : > { %577 = shalt.err (!%p574_p2)
}
  0x1d   : > { %s677_s28 = smov 64   ;;  %s678_s29 = smov 4  }
  0x1e   : > { %490 = dma.hbm_to_vmem [thread:$0]  (!%p756_p11), %s896_s1, 1024, %s132_s22, [#allocation6], %s677_s28, %s677_s28, %s678_s29  }
  0x1f   : > { %p25_p9 = scmp.eq.s32.totalorder %s24_s26, 0  ;;  %p34_p12 = scmp.ne.s32.totalorder %s670_s14, %s666_s13 }
  0x20   : > { %p35_p10 = scmp.eq.s32.totalorder %s674_s15, 0  ;;  %p500_p2 = scmp.lt.s32.totalorder %s674_s15, 2 }
  0x21   : > { %s778_s5 = scalar_select %p25_p9, %s670_s14, %s27_s25  }
  0x22   : > { %p36_p13 = por %p35_p10, %p34_p12  ;;  %p907_p0 = scmp.eq.s32.totalorder %s728_s16, 1 }
  0x23   : > { %s148_s7 = sand.u32 1, %s670_s14   ;;  %s448_s8 = sshll.u32 %s674_s15, 8 }
  0x24   : > { %p782_p3 = por %p907_p0, %p34_p12  ;;  %s427_s9 = sshll.u32 %s148_s7, 4 }
  0x25   : > { %s791_s17 = scalar_lea.hbm %s895_s0, %s448_s8  ;;  %s152_s21 = scalar_lea.vmem [#allocation2], %s427_s9 }
  0x26   : > { %s908_s6 = scalar_select %p782_p3, 1, 0 }
  0x27   : > { %s159_s22 = sshll.u32 %s152_s21, 4  ;;  %p793_p11 = pnand %p500_p2, %p36_p13  ;;  %s797_s22 = int_to_ptr.vmem [resolvable:$true] %s159_s22 }
  0x28   : > { %s799_s25 = scalar_lea.sflag [#allocation3], %s148_s7  ;;  %s578_s26 = scalar_lea.hbm %s791_s17, 256 }
  0x29   : > { %p579_p5 = scmp.ne.s32.totalorder %s791_s17, %s578_s26  ;;  %p580_p7 = pneg %p793_p11 }
  0x2a   : > { %s583_s29 = scalar_lea.hbm %s895_s0, 512  ;;  %p584_p10 = scmp.lt.s32.totalorder %s791_s17, %s895_s0 }
  0x2b   : > { %p581_p9 = pnand %p580_p7, %p579_p5  ;;  %p585_p2 = scmp.lt.s32.totalorder %s583_s29, %s578_s26 }
  0x2d   : > { %p582_p12 = pneg %p581_p9  ;;  %p586_p13 = por %p585_p2, %p584_p10 }
  0x2f   : > { %p587_p0 = pnand %p586_p13, %p582_p12 }
  0x31   : > { %590 = shalt.err (!%p587_p0)
}
  0x32   : > { %s591_s7 = scalar_lea.vmem %s797_s22, 256  ;;  %s679_s8 = smov [#allocation2]  }
  0x33   : > { %p592_p1 = scmp.ne.s32.totalorder %s797_s22, %s591_s7  ;;  %s596_s9 = sshll.u32 %s679_s8, 4  ;;  %s597_s9 = int_to_ptr.vmem [resolvable:$false] %s596_s9 }
  0x34   : > { %s598_s10 = scalar_lea.vmem %s597_s9, 512  ;;  %p599_p9 = scmp.lt.s32.totalorder %s797_s22, %s597_s9 }
  0x35   : > { %p594_p6 = pnand %p592_p1, %p580_p7  ;;  %p600_p3 = scmp.lt.s32.totalorder %s598_s10, %s591_s7 }
  0x37   : > { %p595_p5 = pneg %p594_p6  ;;  %p601_p4 = por %p600_p3, %p599_p9 }
  0x39   : > { %p602_p8 = pnand %p601_p4, %p595_p5 }
  0x3b   : > { %605 = shalt.err (!%p602_p8)
}
  0x3c   : > { %s680_s11 = smov 128   ;;  %s681_s21 = smov 8  }
  0x3d   : > { %494 = dma.hbm_to_vmem [thread:$0]  (!%p793_p11), %s791_s17, 256, %s797_s22, %s799_s25, %s680_s11, %s680_s11, %s681_s21  }
  0x3e   : > { %p910_p1 = scmp.ne.s32.totalorder %s905_s20, 0 }
  0x3f   : > { %s823_s26 = sand.u32 (!%p910_p1), 1, %s666_s13   ;;  %p911_p4 = scmp.ne.s32.totalorder (!%p910_p1), %s903_s18, 0 }
  0x40   : > { %171 = sbr.rel (%p910_p1) target bundleno = 321 (0x141), region = 32  ;;  %s431_s27 = sshll.u32 (!%p910_p1), %s823_s26, 4 }
  0x41   : > { %s174_s28 = scalar_lea.sflag (!%p910_p1), [#allocation3], %s823_s26  ;;  %s829_s29 = scalar_lea.vmem (!%p910_p1), [#allocation2], %s431_s27 }
  0x45   : > { %649 = dma.done.wait (%p911_p4), %s174_s28, 256  }
  0x46   : > { %651 = vsyncadd (%p911_p4), %s174_s28, 4294967040  ;;  %p912_p6 = scmp.eq.s32.totalorder %s728_s16, 0 }
  0x48   : > { %653 = dma.done.wait (%p912_p6), [#allocation6], 1024   ;;  %p913_p8 = pmov %p912_p6 }
  0x49   : > { %v682_v0 = vmov 0.0   ;;  %vm683_vm0 = vmmov 0   ;;  %v544_v1 = vld [vmem:[#allocation5 + $0x38] sm:$0xff]   ;;  %v545_v2 = vld [vmem:[#allocation5 + $0x30] sm:$0xff]   ;;  %v546_v3 = vld [vmem:[#allocation5 + $0x28] sm:$0xff]   ;;  %s203_s17 = scalar_lea.vmem [#allocation7], %s431_s27 }
  0x4a   : > { %655 = vsyncadd (%p913_p8), [#allocation6], 4294966272  ;;  %459 = vmatprep.subr.bf16.mxu0 %v682_v0  ;;  %475 = vmatprep.mubr.msk.bf16.mxu0 %vm683_vm0, %v682_v0  ;;  %v547_v4 = vld [vmem:[#allocation5 + $0x20] sm:$0xff]   ;;  %v548_v5 = vld [vmem:[#allocation5 + $0x18] sm:$0xff]   ;;  %s340_s22 = sshll.u32 %s203_s17, 4  ;;  %s449_s23 = sshll.u32 %s728_s16, 8  ;;  %s847_s22 = int_to_ptr.vmem [resolvable:$true] %s340_s22 }
  0x4b   : > { %460 = vmatpush3.bf16.msra.mxu0 %v544_v1  ;;  %v549_v6 = vld [vmem:[#allocation5 + $0x10] sm:$0xff]   ;;  %v550_v7 = vld [vmem:[#allocation5 + $0x8] sm:$0xff]   ;;  %v551_v8 = vld [vmem:[#allocation5] sm:$0xff]   ;;  %s852_s4 = scalar_lea.hbm %s898_s3, %s449_s23  ;;  %s327_s7 = scalar_lea.sflag [#allocation4], %s823_s26 }
  0x4c   : > { %461 = vmatprep.subr.bf16.mxu0 %v682_v0  ;;  %v207_v9 = vld [vmem:[%s829_s29] sm:$0xff]  ;;  %v208_v10 = vld [vmem:[%s829_s29 + $0x8] sm:$0xff]  ;;  %s606_s8 = scalar_lea.vmem %s847_s22, 256  ;;  %p914_p11 = scmp.ne.s32.totalorder %s908_s6, 0 }
  0x4d   : > { %v209_v11 = vpack.c.bf16 %v208_v10, %v207_v9  ;;  %v434_v12 = vld [vmem:[%s897_s2] ss:$0 sm:$0xff]  ;;  %p607_p3 = scmp.ne.s32.totalorder %s847_s22, %s606_s8  ;;  %s684_s16 = smov [#allocation7]  }
  0x4e   : > { %s610_s9 = sshll.u32 %s684_s16, 4  ;;  %s611_s9 = int_to_ptr.vmem [resolvable:$false] %s610_s9 }
  0x4f   : > { %462 = vmatpush3.bf16.msra.mxu0 %v545_v2  ;;  %p608_p7 = pnand %p607_p3, %p914_p11  ;;  %s612_s10 = scalar_lea.vmem %s611_s9, 512 }
  0x50   : > { %463 = vmatprep.subr.bf16.mxu0 %v682_v0  ;;  %p613_p10 = scmp.lt.s32.totalorder %s847_s22, %s611_s9  ;;  %p614_p2 = scmp.lt.s32.totalorder %s612_s10, %s606_s8 }
  0x51   : > { %p609_p12 = pneg %p608_p7 }
  0x52   : > { %p615_p13 = por %p614_p2, %p613_p10 }
  0x53   : > { %464 = vmatpush3.bf16.msra.mxu0 %v546_v3 }
  0x54   : > { %465 = vmatprep.subr.bf16.mxu0 %v682_v0  ;;  %p616_p0 = pnand %p615_p13, %p609_p12 }
  0x57   : > { %466 = vmatpush3.bf16.msra.mxu0 %v547_v4 }
  0x58   : > { %467 = vmatprep.subr.bf16.mxu0 %v682_v0 }
  0x5b   : > { %468 = vmatpush3.bf16.msra.mxu0 %v548_v5 }
  0x5c   : > { %469 = vmatprep.subr.bf16.mxu0 %v682_v0 }
  0x5f   : > { %470 = vmatpush3.bf16.msra.mxu0 %v549_v6 }
  0x60   : > { %471 = vmatprep.subr.bf16.mxu0 %v682_v0 }
  0x63   : > { %472 = vmatpush3.bf16.msra.mxu0 %v550_v7 }
  0x64   : > { %473 = vmatprep.subr.bf16.mxu0 %v682_v0 }
  0x67   : > { %474 = vmatpush3.bf16.msra.mxu0 %v551_v8 }
  0x6a   : > { %476 = vmatmul.mubr.bf16.vlgmr.msra.gmra.mxu0 %v209_v11 }
 0x12a   : > { %v315_v13 = vpop.f32.mrf.mxu0 }
 0x12b   : > { %v316_v14 = vadd.f32 %v434_v12, %v315_v13 }
 0x12c   : > { %v477_v15 = vpop.f32.mrf.mxu0 }
 0x12d   : > { %v322_v16 = vmax.f32 %v316_v14, 0.0 }
 0x12e   : > { %v318_v17 = vpop.f32.mrf.mxu0 }
 0x12f   : > { %324 = vst [vmem:[%s203_s17] sm:$0xff] %v322_v16  ;;  %v319_v18 = vadd.f32 %v434_v12, %v318_v17 }
 0x130   : > { %v478_v19 = vpop.f32.mrf.mxu0 }
 0x131   : > { %v323_v20 = vmax.f32 %v319_v18, 0.0 }
 0x133   : > { %325 = vst [vmem:[%s203_s17 + $0x8] sm:$0xff] %v323_v20 }
 0x134   : > { %619 = shalt.err (!%p616_p0)
}
 0x135   : > { %s620_s11 = scalar_lea.hbm %s852_s4, 256  ;;  %s624_s28 = scalar_lea.hbm %s898_s3, 512 }
 0x136   : > { %p621_p5 = scmp.ne.s32.totalorder %s852_s4, %s620_s11  ;;  %p625_p4 = scmp.lt.s32.totalorder %s852_s4, %s898_s3 }
 0x137   : > { %p626_p6 = scmp.lt.s32.totalorder %s624_s28, %s620_s11 }
 0x138   : > { %p622_p9 = pnand %p621_p5, %p914_p11 }
 0x139   : > { %p627_p8 = por %p626_p6, %p625_p4 }
 0x13a   : > { %p623_p1 = pneg %p622_p9 }
 0x13c   : > { %p628_p3 = pnand %p627_p8, %p623_p1 }
 0x13e   : > { %631 = shalt.err (!%p628_p3)
}
 0x13f   : > { %s685_s20 = smov 128   ;;  %s686_s17 = smov 8  }
 0x140   : > { %485 = dma.vmem_to_hbm [thread:$0]  (%p914_p11), %s847_s22, 256, %s852_s4, %s327_s7, %s685_s20, %s685_s20, %s686_s17  }
 0x141 PF: > { %s355_s23 = sand.u32 1, %s662_s12   ;;  %p915_p7 = scmp.ne.s32.totalorder %s904_s19, 0 }
 0x142   : > { %p916_p12 = scmp.ge.s32.totalorder %s674_s15, 2  ;;  %s356_s25 = scalar_lea.sflag [#allocation4], %s355_s23 }
 0x144   : > { %p496_p10 = pnand %p916_p12, %p915_p7 }
 0x146   : > { %p497_p2 = pneg %p496_p10 }
 0x148   : > { %657 = dma.done.wait (%p497_p2), %s356_s25, 256  }
 0x149   : > { %659 = vsyncadd (%p497_p2), %s356_s25, 4294967040  ;;  %p17_p13 = scmp.ge.s32.totalorder %s761_s24, 4   ;;  %s917_s12 = smov %s666_s13 }
 0x14a   : > { %s918_s13 = smov %s670_s14  ;;  %s919_s14 = smov %s778_s5 }
 0x14b   : > { %s920_s15 = smov %s761_s24  ;;  %19 = sbr.rel (!%p17_p13) target bundleno = 6 (0x6), region = 81 }
 0x150   :  { %361 = vsyncpa [#allocation3], 1 }
 0x151   :  { %363 = vsyncpa [#allocation3 + $0x1], 1 }
 0x152   :  { %364 = vsyncpa [#allocation6], 1 }
 0x153   :  { %365 = vsyncpa [#allocation4], 1 }
 0x154   :  { %367 = vsyncpa [#allocation4 + $0x1], 1 }

</bundles_post_ra>
